<compile_context>
chip_gen: v7x
topology: tpu7x:2x2x1
jax: 0.10.0
libtpu: 0.0.40
codegen_flags: <defaults>
</compile_context>

<pallas_src>
import numpy as np
import jax
import jax.numpy as jnp
from jax.experimental import pallas as pl
from jax.experimental.pallas import tpu as pltpu


def basic_block_kernel(x_ref, a1_ref, b1_ref, a2_ref, b2_ref, o_ref):
    """B images per grid step, lane-dense (rows, W*C) layout.

    x_ref : (B, H, WC)   f32   unpadded input slab (also the residual source)
    a1_ref: (3*WC, WC)   bf16  conv1 block-Toeplitz weights (BN1 scale folded in)
    b1_ref: (1, WC)      f32   folded BN1 shift
    a2_ref: (3*WC, WC)   bf16  conv2 block-Toeplitz weights (BN2 scale folded in)
    b2_ref: (1, WC)      f32   folded BN2 shift
    o_ref : (B, H, WC)   f32   output slab
    """
    B, H, WC = o_ref.shape

    x = x_ref[...]                                            # (B, H, WC) f32

    def fused_lhs(v_bf16):
        # v_bf16: (B, H, WC) bf16 -> (B*H, 3*WC) bf16.
        # Per-image zero H halo: row y of the three K-blocks holds
        # [v[y-1], v[y], v[y+1]] (zeros outside the image).
        z = jnp.zeros((B, 1, WC), jnp.bfloat16)
        up = jnp.concatenate([z, v_bf16[:, :H - 1, :]], axis=1)    # row y -> v[y-1]
        dn = jnp.concatenate([v_bf16[:, 1:, :], z], axis=1)        # row y -> v[y+1]
        return jnp.concatenate([up, v_bf16, dn], axis=2).reshape(B * H, 3 * WC)

    # ---- conv1 (+ BN1 scale) as one MXU matmul; BN1 shift + ReLU (f32) ----
    lhs1 = fused_lhs(x.astype(jnp.bfloat16))                  # (B*H, 3*WC) bf16
    acc1 = jnp.dot(lhs1, a1_ref[...],
                   preferred_element_type=jnp.float32)        # (B*H, WC) f32
    h1 = jnp.maximum(acc1 + b1_ref[...], 0.0)                 # (B*H, WC) f32

    # ---- conv2 (+ BN2 scale); BN2 shift + residual + ReLU (f32) ----
    lhs2 = fused_lhs(h1.reshape(B, H, WC).astype(jnp.bfloat16))
    acc2 = jnp.dot(lhs2, a2_ref[...],
                   preferred_element_type=jnp.float32)        # (B*H, WC) f32
    out = acc2 + b2_ref[...] + x.reshape(B * H, WC)
    o_ref[...] = jnp.maximum(out, 0.0).reshape(B, H, WC).astype(o_ref.dtype)


def _expand_toeplitz(w_oihw, W):
    """(Cout, Cin, 3, 3) conv weight -> (3*W*Cin, W*Cout) banded block-Toeplitz.

    Row index = dy*W*Cin + x_in*Cin + ci
    Col index =            x_out*Cout + co
    Entry     = w[dy, dx, ci, co] with dx = x_in - x_out + 1 in {0,1,2},
    which also implements the zero padding along W.  Returned in f32 so BN
    scales can be folded in before the bf16 cast.
    """
    w = jnp.transpose(w_oihw, (2, 3, 1, 0)).astype(jnp.float32)   # (3,3,Ci,Co)
    Ci, Co = w.shape[2], w.shape[3]
    blocks = []
    for dy in range(3):
        a = jnp.zeros((W * Ci, W * Co), jnp.float32)
        for dx in range(3):
            shift = jnp.eye(W, k=-(dx - 1), dtype=jnp.float32)    # x_in = x_out+dx-1
            a = a + jnp.kron(shift, w[dy, dx])
        blocks.append(a)
    return jnp.concatenate(blocks, axis=0)                        # (3*W*Ci, W*Co)


def prepare_basic_block_weights(w1_oihw, bn1, w2_oihw, bn2, W, eps=1e-5):
    """Weight preprocessing: fold eval-mode BN scale into the Toeplitz columns
    (dot(lhs, A*diag(s)) == dot(lhs, A)*s), keep only the add-shift for the
    epilogue, and cast the matmul operands to bf16."""
    C = w1_oihw.shape[0]
    WC = W * C

    def fold(bn):
        g, b, m, v = bn
        s = g / jnp.sqrt(v + eps)
        return s, b - m * s

    s1, sh1 = fold(bn1)
    s2, sh2 = fold(bn2)

    a1 = (_expand_toeplitz(w1_oihw, W) * jnp.tile(s1, W)[None, :]).astype(jnp.bfloat16)
    a2 = (_expand_toeplitz(w2_oihw, W) * jnp.tile(s2, W)[None, :]).astype(jnp.bfloat16)
    b1 = jnp.tile(sh1, W).reshape(1, WC).astype(jnp.float32)
    b2 = jnp.tile(sh2, W).reshape(1, WC).astype(jnp.float32)
    return a1, b1, a2, b2


def _pick_block_b(N, target=8):
    """Largest divisor of N that is <= target while keeping >= 2 grid steps
    (so v7x's two TensorCores both get work via the 'parallel' grid axis)."""
    best = None
    for b in range(1, min(N, target) + 1):
        if N % b == 0 and N // b >= 2:
            best = b
    return best if best is not None else N


def basic_block_pallas_slab(x_slab, a1, b1, a2, b2, *, block_b=None):
    """Slab-level entry point: x_slab is (N, H, W*C) f32.  Use this layout
    across consecutive BasicBlocks to avoid per-block transpose HBM passes."""
    N, H, WC = x_slab.shape
    if block_b is None:
        block_b = _pick_block_b(N)
    assert N % block_b == 0, "batch must be divisible by the batch-block size"

    return pl.pallas_call(
        basic_block_kernel,
        out_shape=jax.ShapeDtypeStruct((N, H, WC), jnp.float32),
        grid_spec=pltpu.PrefetchScalarGridSpec(
            num_scalar_prefetch=0,
            grid=(N // block_b,),
            in_specs=[
                pl.BlockSpec((block_b, H, WC), lambda n: (n, 0, 0)),
                pl.BlockSpec((a1.shape[0], a1.shape[1]), lambda n: (0, 0)),
                pl.BlockSpec((1, WC), lambda n: (0, 0)),
                pl.BlockSpec((a2.shape[0], a2.shape[1]), lambda n: (0, 0)),
                pl.BlockSpec((1, WC), lambda n: (0, 0)),
            ],
            out_specs=pl.BlockSpec((block_b, H, WC), lambda n: (n, 0, 0)),
        ),
        compiler_params=pltpu.CompilerParams(
            dimension_semantics=("parallel",),
            vmem_limit_bytes=32 * 1024 * 1024),
    )(x_slab, a1, b1, a2, b2)


def basic_block_pallas(x_nchw, w1_oihw, bn1, w2_oihw, bn2, eps=1e-5,
                       block_b=None):
    """x_nchw: (N, C, H, W) float32.  bn*: (gamma, beta, mean, var)."""
    N, C, H, W = x_nchw.shape
    WC = W * C

    a1, b1, a2, b2 = prepare_basic_block_weights(w1_oihw, bn1, w2_oihw, bn2,
                                                 W, eps)

    # Layout glue only (NCHW <-> lane-dense slab).  In a real network, keep
    # the (N, H, W*C) slab across consecutive BasicBlocks and convert once at
    # the model boundaries: each transpose is a full HBM round trip of x.
    x_slab = jnp.transpose(x_nchw, (0, 2, 3, 1)).reshape(N, H, WC)
    x_slab = x_slab.astype(jnp.float32)

    out_slab = basic_block_pallas_slab(x_slab, a1, b1, a2, b2, block_b=block_b)

    return jnp.transpose(out_slab.reshape(N, H, W, C), (0, 3, 1, 2))


def basic_block_ref(x, w1, bn1, w2, bn2, eps=1e-5):
    """Pure-JAX f32 reference (NCHW / OIHW), eval-mode BN."""
    def conv(inp, w):
        return jax.lax.conv_general_dilated(
            inp, w, window_strides=(1, 1), padding=((1, 1), (1, 1)),
            dimension_numbers=("NCHW", "OIHW", "NCHW"))

    def bn(inp, p):
        g, b, m, v = p
        s = g / jnp.sqrt(v + eps)
        sh = b - m * s
        return inp * s[None, :, None, None] + sh[None, :, None, None]

    out = jnp.maximum(bn(conv(x, w1), bn1), 0.0)
    out = bn(conv(out, w2), bn2) + x
    return jnp.maximum(out, 0.0)


if __name__ == "__main__":
    # BasicBlock(inplanes=8, planes=8, stride=1); W*C = 128 -> lane-dense slabs.
    # N = 16 with batch-block B = 8 -> grid=(2,), M = B*H = 128 rows per matmul.
    N, C, H, W = 16, 8, 16, 16
    key = jax.random.PRNGKey(0)
    k = jax.random.split(key, 12)

    x = jax.random.normal(k[0], (N, C, H, W), jnp.float32)

    w1 = 0.1 * jax.random.normal(k[1], (C, C, 3, 3), jnp.float32)  # OIHW
    w2 = 0.1 * jax.random.normal(k[2], (C, C, 3, 3), jnp.float32)

    bn1 = (1.0 + 0.1 * jax.random.normal(k[3], (C,), jnp.float32),   # gamma
           0.1 * jax.random.normal(k[4], (C,), jnp.float32),          # beta
           0.1 * jax.random.normal(k[5], (C,), jnp.float32),          # running_mean
           1.0 + 0.1 * jnp.abs(jax.random.normal(k[6], (C,))))        # running_var
    bn2 = (1.0 + 0.1 * jax.random.normal(k[7], (C,), jnp.float32),
           0.1 * jax.random.normal(k[8], (C,), jnp.float32),
           0.1 * jax.random.normal(k[9], (C,), jnp.float32),
           1.0 + 0.1 * jnp.abs(jax.random.normal(k[10], (C,))))

    out = basic_block_pallas(x, w1, bn1, w2, bn2)
    out = jax.block_until_ready(out)

    ref = jax.block_until_ready(basic_block_ref(x, w1, bn1, w2, bn2))
    # bf16 MXU operands (f32 accumulation / epilogue) vs a pure-f32 reference:
    # worst-case element error at these magnitudes is ~1e-2, so compare at 2e-2.
    np.testing.assert_allclose(np.asarray(out), np.asarray(ref),
                               rtol=2e-2, atol=2e-2)
    print("KERNEL_OK")
</pallas_src>

<mosaic_0001>
module attributes {stable_mosaic.version = 11 : i64} {
  func.func @basic_block_kernel(%arg0: i32, %arg1: memref<8x16x128xf32, #tpu.memory_space<vmem>>, %arg2: memref<384x128xbf16, #tpu.memory_space<vmem>>, %arg3: memref<1x128xf32, #tpu.memory_space<vmem>>, %arg4: memref<384x128xbf16, #tpu.memory_space<vmem>>, %arg5: memref<1x128xf32, #tpu.memory_space<vmem>>, %arg6: memref<8x16x128xf32, #tpu.memory_space<vmem>>) attributes {dimension_semantics = [#tpu.dimension_semantics<parallel>], iteration_bounds = array<i64: 2>, scalar_prefetch = 0 : i64, scratch_operands = 0 : i64, tpu.core_type = #tpu.core_type<tc>, window_params = [{transform_indices = @transform_0, window_bounds = array<i64: 8, 16, 128>}, {pipeline_mode = #tpu.pipeline_mode<synchronous>, transform_indices = @transform_1, window_bounds = array<i64: 384, 128>}, {pipeline_mode = #tpu.pipeline_mode<synchronous>, transform_indices = @transform_2, window_bounds = array<i64: 1, 128>}, {pipeline_mode = #tpu.pipeline_mode<synchronous>, transform_indices = @transform_3, window_bounds = array<i64: 384, 128>}, {pipeline_mode = #tpu.pipeline_mode<synchronous>, transform_indices = @transform_4, window_bounds = array<i64: 1, 128>}, {transform_indices = @transform_5, window_bounds = array<i64: 8, 16, 128>}]} {
    %c0 = arith.constant 0 : index
    %c0_0 = arith.constant 0 : index
    %c0_1 = arith.constant 0 : index
    %0 = vector.load %arg1[%c0, %c0_0, %c0_1] : memref<8x16x128xf32, #tpu.memory_space<vmem>>, vector<8x16x128xf32>
    %1 = arith.truncf %0 : vector<8x16x128xf32> to vector<8x16x128xbf16>
    %cst = arith.constant 0.000000e+00 : bf16
    %2 = vector.broadcast %cst : bf16 to vector<8x1x128xbf16>
    %3 = vector.extract_strided_slice %1 {offsets = [0, 0, 0], sizes = [8, 15, 128], strides = [1, 1, 1]} : vector<8x16x128xbf16> to vector<8x15x128xbf16>
    %4 = tpu.concatenate %2, %3 in 1 : vector<8x1x128xbf16>, vector<8x15x128xbf16> -> vector<8x16x128xbf16>
    %5 = vector.extract_strided_slice %1 {offsets = [0, 1, 0], sizes = [8, 15, 128], strides = [1, 1, 1]} : vector<8x16x128xbf16> to vector<8x15x128xbf16>
    %6 = tpu.concatenate %5, %2 in 1 : vector<8x15x128xbf16>, vector<8x1x128xbf16> -> vector<8x16x128xbf16>
    %7 = tpu.concatenate %4, %1, %6 in 2 : vector<8x16x128xbf16>, vector<8x16x128xbf16>, vector<8x16x128xbf16> -> vector<8x16x384xbf16>
    %8 = vector.shape_cast %7 : vector<8x16x384xbf16> to vector<128x384xbf16>
    %c0_2 = arith.constant 0 : index
    %c0_3 = arith.constant 0 : index
    %9 = vector.load %arg2[%c0_2, %c0_3] : memref<384x128xbf16, #tpu.memory_space<vmem>>, vector<384x128xbf16>
    %cst_4 = arith.constant dense<0.000000e+00> : vector<128x128xf32>
    %10 = tpu.matmul %8, %9, %cst_4 {dimension_numbers = #tpu.dot_dimension_numbers<[1], [0], [0], [1], [0, 0, 1, 1], [], []>} : vector<128x384xbf16>, vector<384x128xbf16>, vector<128x128xf32> -> vector<128x128xf32>
    %c0_5 = arith.constant 0 : index
    %c0_6 = arith.constant 0 : index
    %11 = vector.load %arg3[%c0_5, %c0_6] : memref<1x128xf32, #tpu.memory_space<vmem>>, vector<1x128xf32>
    %12 = vector.broadcast %11 : vector<1x128xf32> to vector<128x128xf32>
    %13 = arith.addf %10, %12 : vector<128x128xf32>
    %cst_7 = arith.constant 0.000000e+00 : f32
    %14 = vector.broadcast %cst_7 : f32 to vector<128x128xf32>
    %15 = arith.maximumf %13, %14 : vector<128x128xf32>
    %16 = vector.shape_cast %15 : vector<128x128xf32> to vector<8x16x128xf32>
    %17 = arith.truncf %16 : vector<8x16x128xf32> to vector<8x16x128xbf16>
    %cst_8 = arith.constant 0.000000e+00 : bf16
    %18 = vector.broadcast %cst_8 : bf16 to vector<8x1x128xbf16>
    %19 = vector.extract_strided_slice %17 {offsets = [0, 0, 0], sizes = [8, 15, 128], strides = [1, 1, 1]} : vector<8x16x128xbf16> to vector<8x15x128xbf16>
    %20 = tpu.concatenate %18, %19 in 1 : vector<8x1x128xbf16>, vector<8x15x128xbf16> -> vector<8x16x128xbf16>
    %21 = vector.extract_strided_slice %17 {offsets = [0, 1, 0], sizes = [8, 15, 128], strides = [1, 1, 1]} : vector<8x16x128xbf16> to vector<8x15x128xbf16>
    %22 = tpu.concatenate %21, %18 in 1 : vector<8x15x128xbf16>, vector<8x1x128xbf16> -> vector<8x16x128xbf16>
    %23 = tpu.concatenate %20, %17, %22 in 2 : vector<8x16x128xbf16>, vector<8x16x128xbf16>, vector<8x16x128xbf16> -> vector<8x16x384xbf16>
    %24 = vector.shape_cast %23 : vector<8x16x384xbf16> to vector<128x384xbf16>
    %c0_9 = arith.constant 0 : index
    %c0_10 = arith.constant 0 : index
    %25 = vector.load %arg4[%c0_9, %c0_10] : memref<384x128xbf16, #tpu.memory_space<vmem>>, vector<384x128xbf16>
    %cst_11 = arith.constant dense<0.000000e+00> : vector<128x128xf32>
    %26 = tpu.matmul %24, %25, %cst_11 {dimension_numbers = #tpu.dot_dimension_numbers<[1], [0], [0], [1], [0, 0, 1, 1], [], []>} : vector<128x384xbf16>, vector<384x128xbf16>, vector<128x128xf32> -> vector<128x128xf32>
    %c0_12 = arith.constant 0 : index
    %c0_13 = arith.constant 0 : index
    %27 = vector.load %arg5[%c0_12, %c0_13] : memref<1x128xf32, #tpu.memory_space<vmem>>, vector<1x128xf32>
    %28 = vector.broadcast %27 : vector<1x128xf32> to vector<128x128xf32>
    %29 = arith.addf %26, %28 : vector<128x128xf32>
    %30 = vector.shape_cast %0 : vector<8x16x128xf32> to vector<128x128xf32>
    %31 = arith.addf %29, %30 : vector<128x128xf32>
    %cst_14 = arith.constant 0.000000e+00 : f32
    %32 = vector.broadcast %cst_14 : f32 to vector<128x128xf32>
    %33 = arith.maximumf %31, %32 : vector<128x128xf32>
    %34 = vector.shape_cast %33 : vector<128x128xf32> to vector<8x16x128xf32>
    %c0_15 = arith.constant 0 : index
    %c0_16 = arith.constant 0 : index
    %c0_17 = arith.constant 0 : index
    %35 = vector.load %arg6[%c0_15, %c0_16, %c0_17] : memref<8x16x128xf32, #tpu.memory_space<vmem>>, vector<8x16x128xf32>
    tpu.vector_store %arg6[%c0_15, %c0_16, %c0_17], %34 {strides = array<i32>} : memref<8x16x128xf32, #tpu.memory_space<vmem>>, vector<8x16x128xf32>,
    return
  }
  func.func @transform_0(%arg0: i32) -> (i32, i32, i32) {
    %c0_i32 = arith.constant 0 : i32
    %c0_i32_0 = arith.constant 0 : i32
    %c0_i32_1 = arith.constant 0 : i32
    return %arg0, %c0_i32, %c0_i32_0 : i32, i32, i32
  }
  func.func @transform_1(%arg0: i32) -> (i32, i32) {
    %c0_i32 = arith.constant 0 : i32
    %c0_i32_0 = arith.constant 0 : i32
    %c0_i32_1 = arith.constant 0 : i32
    return %c0_i32, %c0_i32_0 : i32, i32
  }
  func.func @transform_2(%arg0: i32) -> (i32, i32) {
    %c0_i32 = arith.constant 0 : i32
    %c0_i32_0 = arith.constant 0 : i32
    %c0_i32_1 = arith.constant 0 : i32
    return %c0_i32, %c0_i32_0 : i32, i32
  }
  func.func @transform_3(%arg0: i32) -> (i32, i32) {
    %c0_i32 = arith.constant 0 : i32
    %c0_i32_0 = arith.constant 0 : i32
    %c0_i32_1 = arith.constant 0 : i32
    return %c0_i32, %c0_i32_0 : i32, i32
  }
  func.func @transform_4(%arg0: i32) -> (i32, i32) {
    %c0_i32 = arith.constant 0 : i32
    %c0_i32_0 = arith.constant 0 : i32
    %c0_i32_1 = arith.constant 0 : i32
    return %c0_i32, %c0_i32_0 : i32, i32
  }
  func.func @transform_5(%arg0: i32) -> (i32, i32, i32) {
    %c0_i32 = arith.constant 0 : i32
    %c0_i32_0 = arith.constant 0 : i32
    %c0_i32_1 = arith.constant 0 : i32
    return %arg0, %c0_i32, %c0_i32_0 : i32, i32, i32
  }
}

</mosaic_0001>

<bundles_post_ra>
// kernel: tpu_custom_call.1
= control target key start
LH: loop header
LB: loop body
LE: loop exit
PB: predicated region body
PF: predicated region fallthrough
CT: control target
= control target key end

     0   :  { %10 = vsyncpa [#allocation3], 0  ;;  %s2596_s0 = inlined_call_operand.hbm [shape: f32[16,16,128], index: 0, kind: input, shape index: {}]   ;;  %s2597_s1 = inlined_call_operand.hbm [shape: bf16[384,128], index: 1, kind: input, shape index: {}]   ;;  %s2598_s2 = inlined_call_operand.vmem [shape: f32[1,128], index: 2, kind: input, shape index: {}]   ;;  %s2599_s3 = inlined_call_operand.hbm [shape: bf16[384,128], index: 3, kind: input, shape index: {}]   ;;  %s2600_s4 = inlined_call_operand.vmem [shape: f32[1,128], index: 4, kind: input, shape index: {}]   ;;  %s2601_s5 = inlined_call_operand.hbm [shape: f32[16,16,128], index: 5, kind: output, shape index: {}]  }
   0x1   :  { %12 = vsyncpa [#allocation3 + $0x1], 0 }
   0x2   :  { %13 = vsyncpa [#allocation6], 0 }
   0x3   :  { %14 = vsyncpa [#allocation4], 0 }
   0x4   :  { %16 = vsyncpa [#allocation4 + $0x1], 0  ;;  %s2100_s18 = smov 0   ;;  %s2102_s19 = smov 0  }
   0x5   :  { %s2104_s20 = smov 0   ;;  %s2106_s21 = smov 0  }
   0x6 LB: > { %s2121_s22 = sadd.s32 4294967295, %s2058_s21   ;;  %s1479_s23 = sadd.s32 4294967294, %s2058_s21   ;;  %s2058_s21 = sphi %s2106_s21, %s2625_s21   ;;  %s2054_s20 = sphi %s2104_s20, %s2624_s20   ;;  %s2050_s19 = sphi %s2102_s19, %s2623_s19   ;;  %s2046_s18 = sphi %s2100_s18, %s2622_s18  }
   0x7   : > { %p42_p0 = scmp.ne.s32.totalorder %s2050_s19, %s2046_s18  ;;  %p2602_p1 = scmp.eq.s32.totalorder %s2121_s22, 0 }
   0x8   : > { %p156_p3 = scmp.eq.s32.totalorder %s1479_s23, 1  ;;  %p1480_p5 = scmp.ge.s32.totalorder %s2058_s21, 1 }
   0x9   : > { %p2130_p4 = por %p2602_p1, %p42_p0  ;;  %p163_p7 = scmp.lt.s32.totalorder %s2058_s21, 3 }
   0xa   : > { %p2135_p6 = por %p156_p3, %p42_p0  ;;  %s2060_s27 = smov [#allocation5]  }
   0xb   : > { %s2605_s24 = scalar_select %p2130_p4, 1, 0 }
   0xc   : > { %s2606_s25 = scalar_select %p2135_p6, 1, 0 }
   0xd   : > { %p2140_p8 = pnand %p1480_p5, %p163_p7  ;;  %s175_s28 = sshll.u32 %s2060_s27, 4  ;;  %s2144_s28 = int_to_ptr.vmem [resolvable:$true] %s175_s28 }
   0xe   : > { %s2061_s30 = smov [#allocation7]   ;;  %s1902_s9 = scalar_lea.hbm %s2597_s1, 3072 }
   0xf   : > { %p1789_p9 = pneg %p2140_p8  ;;  %s191_s6 = sshll.u32 %s2061_s30, 4  ;;  %s2155_s6 = int_to_ptr.vmem [resolvable:$true] %s191_s6 }
  0x10   : > { %p1903_p12 = scmp.ne.s32.totalorder %s2597_s1, %s1902_s9  ;;  %p1909_p5 = scmp.lt.u32.totalorder %s1902_s9, %s2597_s1 }
  0x11   : > { %p2151_p11 = pnand %p1789_p9, %p2602_p1 }
  0x13   : > { %p1904_p13 = pneg %p2151_p11 }
  0x15   : > { %p1905_p0 = pnand %p1904_p13, %p1903_p12 }
  0x17   : > { %p1906_p3 = pneg %p1905_p0 }
  0x19   : > { %p1911_p7 = pnand %p1909_p5, %p1906_p3 }
  0x1b   : > { %1914 = shalt.err (!%p1911_p7)
}
  0x1c   : > { %s1915_s14 = scalar_lea.vmem %s2144_s28, 3072  ;;  %p1923_p2 = scmp.lt.s32.totalorder %s2144_s28, %s2144_s28 }
  0x1d   : > { %p1916_p9 = scmp.ne.s32.totalorder %s2144_s28, %s1915_s14  ;;  %p1924_p12 = scmp.lt.s32.totalorder %s1915_s14, %s1915_s14 }
  0x1f   : > { %p1918_p10 = pnand %p1916_p9, %p1904_p13  ;;  %p1925_p0 = por %p1924_p12, %p1923_p2 }
  0x21   : > { %p1919_p1 = pneg %p1918_p10 }
  0x23   : > { %p1926_p6 = pnand %p1925_p0, %p1919_p1 }
  0x25   : > { %1929 = shalt.err (!%p1926_p6)
}
  0x26   : > { %s2062_s15 = smov 64   ;;  %s2063_s16 = smov 4  }
  0x27   : > { %1792 = dma.hbm_to_vmem [thread:$0]  (!%p2151_p11), %s2597_s1, 3072, %s2144_s28, [#allocation6], %s2062_s15, %s2062_s15, %s2063_s16  }
  0x28   : > { %s1930_s7 = scalar_lea.hbm %s2599_s3, 3072 }
  0x29   : > { %p1931_p2 = scmp.ne.s32.totalorder %s2599_s3, %s1930_s7  ;;  %p1937_p10 = scmp.lt.u32.totalorder %s1930_s7, %s2599_s3 }
  0x2b   : > { %p1933_p1 = pnand %p1931_p2, %p1904_p13 }
  0x2d   : > { %p1934_p6 = pneg %p1933_p1 }
  0x2f   : > { %p1939_p3 = pnand %p1937_p10, %p1934_p6 }
  0x31   : > { %1942 = shalt.err (!%p1939_p3)
}
  0x32   : > { %s1943_s28 = scalar_lea.vmem %s2155_s6, 3072  ;;  %p1951_p12 = scmp.lt.s32.totalorder %s2155_s6, %s2155_s6 }
  0x33   : > { %p1944_p5 = scmp.ne.s32.totalorder %s2155_s6, %s1943_s28  ;;  %p1952_p0 = scmp.lt.s32.totalorder %s1943_s28, %s1943_s28 }
  0x35   : > { %p1946_p7 = pnand %p1944_p5, %p1904_p13  ;;  %p1953_p2 = por %p1952_p0, %p1951_p12 }
  0x37   : > { %p1947_p9 = pneg %p1946_p7 }
  0x39   : > { %p1954_p1 = pnand %p1953_p2, %p1947_p9 }
  0x3b   : > { %1957 = shalt.err (!%p1954_p1)
}
  0x3c   : > { %1795 = dma.hbm_to_vmem [thread:$0]  (!%p2151_p11), %s2599_s3, 3072, %s2155_s6, [#allocation6], %s2062_s15, %s2062_s15, %s2063_s16  }
  0x3d   : > { %s2210_s14 = sadd.s32 1, %s2058_s21   ;;  %s29_s29 = sadd.s32 1, %s2054_s20 }
  0x3e   : > { %s26_s17 = ssub.s32 %s2058_s21, %s2210_s14  ;;  %p36_p13 = scmp.ne.s32.totalorder %s2054_s20, %s2050_s19 }
  0x3f   : > { %p27_p6 = scmp.eq.s32.totalorder %s26_s17, 0  ;;  %p37_p10 = scmp.eq.s32.totalorder %s2058_s21, 0 }
  0x40   : > { %p2609_p3 = scmp.eq.s32.totalorder %s2121_s22, 1  ;;  %p1806_p7 = scmp.lt.s32.totalorder %s2058_s21, 2 }
  0x41   : > { %s2226_s27 = scalar_select %p27_p6, %s2054_s20, %s29_s29  }
  0x42   : > { %p2220_p5 = por %p2609_p3, %p36_p13  ;;  %p38_p9 = por %p37_p10, %p36_p13 }
  0x43   : > { %s208_s30 = sand.u32 1, %s2054_s20   ;;  %s1550_s6 = sshll.u32 %s2058_s21, 11 }
  0x44   : > { %s2610_s23 = scalar_select %p2220_p5, 1, 0 }
  0x45   : > { %s1484_s7 = sshll.u32 %s208_s30, 7  ;;  %s2233_s8 = scalar_lea.hbm %s2596_s0, %s1550_s6 }
  0x46   : > { %s212_s9 = scalar_lea.vmem [#allocation2], %s1484_s7  ;;  %p2237_p11 = pnand %p1806_p7, %p38_p9 }
  0x47   : > { %s220_s10 = sshll.u32 %s212_s9, 4  ;;  %s2241_s28 = scalar_lea.sflag [#allocation3], %s208_s30  ;;  %s2235_s10 = int_to_ptr.vmem [resolvable:$true] %s220_s10 }
  0x48   : > { %s1958_s12 = scalar_lea.hbm %s2233_s8, 2048  ;;  %p1960_p0 = pneg %p2237_p11 }
  0x49   : > { %p1959_p12 = scmp.ne.s32.totalorder %s2233_s8, %s1958_s12  ;;  %s1963_s17 = scalar_lea.hbm %s2596_s0, 4096 }
  0x4a   : > { %p1964_p13 = scmp.lt.u32.totalorder %s2233_s8, %s2596_s0  ;;  %p1965_p6 = scmp.lt.u32.totalorder %s1963_s17, %s1958_s12 }
  0x4b   : > { %p1961_p2 = pnand %p1960_p0, %p1959_p12  ;;  %p1967_p3 = scmp.lt.u32.totalorder %s1958_s12, %s2233_s8 }
  0x4c   : > { %p1966_p10 = por %p1965_p6, %p1964_p13 }
  0x4d   : > { %p1962_p1 = pneg %p1961_p2 }
  0x4e   : > { %p1968_p7 = por %p1967_p3, %p1966_p10 }
  0x50   : > { %p1969_p9 = pnand %p1968_p7, %p1962_p1 }
  0x52   : > { %1972 = shalt.err (!%p1969_p9)
}
  0x53   : > { %s1973_s30 = scalar_lea.vmem %s2235_s10, 2048  ;;  %s2064_s15 = smov [#allocation2]  }
  0x54   : > { %p1974_p12 = scmp.ne.s32.totalorder %s2235_s10, %s1973_s30  ;;  %s1978_s16 = sshll.u32 %s2064_s15, 4  ;;  %s1979_s16 = int_to_ptr.vmem [resolvable:$false] %s1978_s16 }
  0x55   : > { %s1980_s9 = scalar_lea.vmem %s1979_s16, 4096  ;;  %p1981_p4 = scmp.lt.s32.totalorder %s2235_s10, %s1979_s16 }
  0x56   : > { %p1976_p2 = pnand %p1974_p12, %p1960_p0  ;;  %p1982_p13 = scmp.lt.s32.totalorder %s1980_s9, %s1973_s30 }
  0x58   : > { %p1977_p5 = pneg %p1976_p2  ;;  %p1983_p6 = por %p1982_p13, %p1981_p4 }
  0x5a   : > { %p1984_p10 = pnand %p1983_p6, %p1977_p5 }
  0x5c   : > { %1987 = shalt.err (!%p1984_p10)
}
  0x5d   : > { %s2065_s12 = smov 128   ;;  %s2066_s13 = smov 8  }
  0x5e   : > { %1799 = dma.hbm_to_vmem [thread:$0]  (!%p2237_p11), %s2233_s8, 2048, %s2235_s10, %s2241_s28, %s2065_s12, %s2065_s12, %s2066_s13  }
  0x5f   : > { %232 = sbr.rel (%p2140_p8) target bundleno = 668 (0x29c), region = 40  ;;  %s2272_s29 = sand.u32 (!%p2140_p8), 1, %s2050_s19  }
  0x60   : > { %s1489_s17 = sshll.u32 (!%p2140_p8), %s2272_s29, 7  ;;  %s235_s7 = scalar_lea.sflag (!%p2140_p8), [#allocation3], %s2272_s29 }
  0x61   : > { %s2278_s6 = scalar_lea.vmem (!%p2140_p8), [#allocation2], %s1489_s17  ;;  %p2612_p4 = scmp.ne.s32.totalorder (!%p2140_p8), %s2605_s24, 0 }
  0x66   : > { %2033 = dma.done.wait (%p2612_p4), %s235_s7, 2048  }
  0x67   : > { %2035 = vsyncadd (%p2612_p4), %s235_s7, 4294965248  ;;  %p2613_p5 = scmp.eq.s32.totalorder %s2121_s22, 0 }
  0x69   : > { %2037 = dma.done.wait (%p2613_p5), [#allocation6], 6144   ;;  %p2614_p8 = pmov %p2613_p5 }
  0x6a   : > { %v1850_v0 = vld [vmem:[#allocation5 + $0x40] sm:$0xff]   ;;  %v1853_v3 = vld [vmem:[#allocation5 + $0x48] sm:$0xff]   ;;  %v1856_v6 = vld [vmem:[#allocation5 + $0x50] sm:$0xff]   ;;  %vm364_vm0 = vcmask 1040384   ;;  %vm365_vm1 = vsmask.f32 256 }
  0x6b   : > { %2039 = vsyncadd (%p2614_p8), [#allocation6], 4294961152  ;;  %v1851_v1 = vld [vmem:[#allocation5] sm:$0xff]   ;;  %1553 = vmatprep.subr.bf16.mxu0 %v1850_v0  ;;  %v1854_v4 = vld [vmem:[#allocation5 + $0x8] sm:$0xff]   ;;  %vm399_vm2 = vcmask 1047552   ;;  %s2502_s11 = scalar_lea.vmem [#allocation8], %s1489_s17 }
  0x6c   : > { %v1852_v2 = vld [vmem:[#allocation5 + $0x80] sm:$0xff]   ;;  %1554 = vmatpush3.bf16.msra.mxu0 %v1851_v1  ;;  %v1855_v5 = vld [vmem:[#allocation5 + $0x88] sm:$0xff]   ;;  %v1857_v7 = vld [vmem:[#allocation5 + $0x10] sm:$0xff]   ;;  %vm400_vm3 = vsmask.f32 7424  ;;  %s1552_s28 = sshll.u32 %s2121_s22, 11 }
  0x6d   : > { %1713 = vmatprep.subr.bf16.mxu1 %v1852_v2  ;;  %1555 = vmatprep.subr.bf16.mxu0 %v1853_v3  ;;  %v1858_v8 = vld [vmem:[#allocation5 + $0x90] sm:$0xff]   ;;  %v1859_v9 = vld [vmem:[#allocation5 + $0x58] sm:$0xff]   ;;  %v1862_v12 = vld [vmem:[#allocation5 + $0x60] sm:$0xff]   ;;  %s1387_s30 = sshll.u32 %s2502_s11, 4  ;;  %s2548_s9 = scalar_lea.hbm %s2601_s5, %s1552_s28  ;;  %s2550_s30 = int_to_ptr.vmem [resolvable:$true] %s1387_s30 }
  0x6e   : > { %1714 = vmatpush3.bf16.msra.mxu1 %v1852_v2  ;;  %v1860_v10 = vld [vmem:[#allocation5 + $0x18] sm:$0xff]   ;;  %v1864_v13 = vld [vmem:[#allocation5 + $0xa0] sm:$0xff]   ;;  %v1865_v15 = vld [vmem:[#allocation5 + $0x68] sm:$0xff]   ;;  %s1373_s12 = scalar_lea.sflag [#allocation4], %s2272_s29  ;;  %s1988_s22 = scalar_lea.vmem %s2550_s30, 2048 }
  0x6f   : > { %1715 = vmatprep.subr.bf16.mxu1 %v1855_v5  ;;  %v1861_v11 = vld [vmem:[#allocation5 + $0x98] sm:$0xff]   ;;  %v1863_v14 = vld [vmem:[#allocation5 + $0x20] sm:$0xff]   ;;  %v1867_v16 = vld [vmem:[#allocation5 + $0xa8] sm:$0xff]   ;;  %p1989_p11 = scmp.ne.s32.totalorder %s2550_s30, %s1988_s22  ;;  %p2619_p0 = scmp.ne.s32.totalorder %s2610_s23, 0 }
  0x70   : > { %1556 = vmatpush3.bf16.msra.mxu0 %v1854_v4  ;;  %v1866_v17 = vld [vmem:[#allocation5 + $0x28] sm:$0xff]   ;;  %v1868_v18 = vld [vmem:[#allocation5 + $0x70] sm:$0xff]   ;;  %v1871_v21 = vld [vmem:[#allocation5 + $0x78] sm:$0xff]   ;;  %s2067_s13 = smov [#allocation8]  }
  0x71   : > { %1557 = vmatprep.subr.bf16.mxu0 %v1856_v6  ;;  %v1869_v19 = vld [vmem:[#allocation5 + $0x30] sm:$0xff]   ;;  %v2289_v22 = vld [vmem:[%s2278_s6] sm:$0xff]  ;;  %v2292_v23 = vld [vmem:[%s2278_s6 + $0x8] sm:$0xff]  ;;  %p1990_p1 = pnand %p1989_p11, %p2619_p0  ;;  %s1992_s17 = sshll.u32 %s2067_s13, 4  ;;  %s1993_s17 = int_to_ptr.vmem [resolvable:$false] %s1992_s17 }
  0x72   : > { %1716 = vmatpush3.bf16.msra.mxu1 %v1855_v5  ;;  %v1870_v20 = vld [vmem:[#allocation5 + $0xb0] sm:$0xff]   ;;  %v292_v25 = vpack.c.bf16 %v2292_v23, %v2289_v22  ;;  %v2300_v26 = vld [vmem:[%s2278_s6 + $0x18] sm:$0xff]  ;;  %v2303_v27 = vld [vmem:[%s2278_s6 + $0x20] sm:$0xff]  ;;  %s1994_s7 = scalar_lea.vmem %s1993_s17, 4096  ;;  %p1995_p7 = scmp.lt.s32.totalorder %s2550_s30, %s1993_s17 }
  0x73   : > { %1717 = vmatprep.subr.bf16.mxu1 %v1858_v8  ;;  %v2295_v24 = vld [vmem:[%s2278_s6 + $0x10] sm:$0xff]  ;;  %v2306_v28 = vld [vmem:[%s2278_s6 + $0x28] sm:$0xff]  ;;  %v1873_v29 = vld [vmem:[#allocation5 + $0xb8] sm:$0xff]   ;;  %p1991_p3 = pneg %p1990_p1  ;;  %p1996_p9 = scmp.lt.s32.totalorder %s1994_s7, %s1988_s22 }
  0x74   : > { %1558 = vmatpush3.bf16.msra.mxu0 %v1857_v7  ;;  %v293_v30 = vpack.c.bf16 %v2300_v26, %v2295_v24  ;;  %v2312_v31 = vpack.c.bf16 %v2306_v28, %v2303_v27  ;;  %v2315_v32 = vld [vmem:[%s2278_s6 + $0x30] sm:$0xff]  ;;  %v2318_v33 = vld [vmem:[%s2278_s6 + $0x38] sm:$0xff]  ;;  %641 = vmatprep.mubr.bf16.mxu0 %v292_v25  ;;  %v301_v35 = vshrl.u32 %v292_v25, 16  ;;  %v304_v36 = vshll.u32 %v292_v25, 16  ;;  %vm2327_vm4 = vmand %vm364_vm0, %vm365_vm1 }
  0x75   : > { %1559 = vmatprep.subr.bf16.mxu0 %v1859_v9  ;;  %v1872_v34 = vld [vmem:[#allocation5 + $0x38] sm:$0xff]   ;;  %v2322_v37 = vpack.c.bf16 %v2318_v33, %v2315_v32  ;;  %vm2334_vm5 = vmand %vm399_vm2, %vm400_vm3  ;;  %v2340_v51 = vld [vmem:[%s2278_s6 + $0x40] sm:$0xff]  ;;  %p1997_p12 = por %p1996_p9, %p1995_p7 }
  0x76   : > { %1718 = vmatpush3.bf16.msra.mxu1 %v1858_v8  ;;  %v308_v38 = vshrl.u32 %v293_v30, 16  ;;  %v311_v39 = vshll.u32 %v293_v30, 16  ;;  %v318_v40 = vshll.u32 %v2312_v31, 16  ;;  %v303_v41 = vrot.slane %v301_v35, 7  ;;  %v2343_v52 = vld [vmem:[%s2278_s6 + $0x48] sm:$0xff]  ;;  %v2346_v53 = vld [vmem:[%s2278_s6 + $0x50] sm:$0xff] }
  0x77   : > { %1719 = vmatprep.subr.bf16.mxu1 %v1861_v11  ;;  %v375_v43 = vrot.slane %v304_v36, 1  ;;  %v315_v44 = vshrl.u32 %v2312_v31, 16  ;;  %v325_v45 = vshll.u32 %v2322_v37, 16  ;;  %v322_v50 = vshrl.u32 %v2322_v37, 16  ;;  %v2349_v54 = vld [vmem:[%s2278_s6 + $0x58] sm:$0xff]  ;;  %v288_v58 = vld [vmem:[%s2278_s6 + $0x60] sm:$0xff]  ;;  %p1998_p2 = pnand %p1997_p12, %p1991_p3 }
  0x78   : > { %1560 = vmatpush3.bf16.msra.mxu0 %v1860_v10  ;;  %v377_v47 = vrot.slane %v311_v39, 1  ;;  %v310_v48 = vrot.slane %v308_v38, 7  ;;  %v379_v49 = vrot.slane %v318_v40, 1  ;;  %v306_v55 = vor.u32 %v304_v36, %v303_v41  ;;  %v289_v59 = vld [vmem:[%s2278_s6 + $0x68] sm:$0xff]  ;;  %v290_v60 = vld [vmem:[%s2278_s6 + $0x70] sm:$0xff]  ;;  %v291_v61 = vld [vmem:[%s2278_s6 + $0x78] sm:$0xff] }
  0x79   : > { %1561 = vmatprep.subr.bf16.mxu0 %v1862_v12  ;;  %v376_v56 = vor.u32 %v375_v43, %v301_v35  ;;  %v381_v57 = vrot.slane %v325_v45, 1  ;;  %v1874_v62 = vld [vmem:[#allocation7 + $0x40] sm:$0xff]   ;;  %v1876_v9 = vld [vmem:[#allocation7 + $0x48] sm:$0xff]   ;;  %v317_v10 = vrot.slane %v315_v44, 7  ;;  %v297_v12 = vpack.c.bf16 %v2349_v54, %v2346_v53  ;;  %v1879_v35 = vld [vmem:[#allocation7 + $0x50] sm:$0xff]  }
  0x7a   : > { %1720 = vmatpush3.bf16.msra.mxu1 %v1861_v11  ;;  %v378_v63 = vor.u32 %v377_v47, %v308_v38  ;;  %v380_v0 = vor.u32 %v379_v49, %v315_v44  ;;  %v367_v1 = vsel %vm2327_vm4, 0, %v306_v55  ;;  %v1875_v3 = vld [vmem:[#allocation7] sm:$0xff]   ;;  %v313_v6 = vor.u32 %v311_v39, %v310_v48  ;;  %v1880_v41 = vld [vmem:[#allocation7 + $0x10] sm:$0xff]  }
  0x7b   : > { %1721 = vmatprep.subr.bf16.mxu1 %v1864_v13  ;;  %v402_v2 = vsel %vm2334_vm5, %v376_v56, 0  ;;  %v1877_v4 = vld [vmem:[#allocation7 + $0x80] sm:$0xff]   ;;  %v382_v8 = vor.u32 %v381_v57, %v322_v50  ;;  %v296_v11 = vpack.c.bf16 %v2343_v52, %v2340_v51  ;;  %v320_v25 = vor.u32 %v318_v40, %v317_v10 }
  0x7c   : > { %1562 = vmatpush3.bf16.msra.mxu0 %v1863_v14  ;;  %1729 = vmatprep.mubr.bf16.mxu1 %v402_v2  ;;  %v403_v5 = vsel %vm2334_vm5, %v378_v63, 0  ;;  %v404_v7 = vsel %vm2334_vm5, %v380_v0, 0  ;;  %v2373_v14 = vpack.c.bf16 %v291_v61, %v290_v60  ;;  %v324_v48 = vrot.slane %v322_v50, 7  ;;  %v1884_v10 = vld [vmem:[#allocation7 + $0x60] sm:$0xff]  }
  0x7d   : > { %1563 = vmatprep.subr.bf16.mxu0 %v1865_v15  ;;  %v332_v15 = vshll.u32 %v296_v11, 16  ;;  %v369_v40 = vsel %vm2327_vm4, 0, %v320_v25  ;;  %v1896_v25 = vld [vmem:[#allocation7 + $0xb0] sm:$0xff]  }
  0x7e   : > { %1722 = vmatpush3.bf16.msra.mxu1 %v1864_v13  ;;  %v2371_v13 = vpack.c.bf16 %v289_v59, %v288_v58  ;;  %v353_v39 = vshll.u32 %v2373_v14, 16  ;;  %v350_v57 = vshrl.u32 %v2373_v14, 16  ;;  %v327_v50 = vor.u32 %v325_v45, %v324_v48 }
  0x7f   : > { %1723 = vmatprep.subr.bf16.mxu1 %v1867_v16 }
  0x80   : > { %1564 = vmatpush3.bf16.msra.mxu0 %v1866_v17  ;;  %v339_v17 = vshll.u32 %v297_v12, 16  ;;  %v343_v36 = vshrl.u32 %v2371_v13, 16  ;;  %v370_v59 = vsel %vm2327_vm4, 0, %v327_v50 }
  0x81   : > { %1565 = vmatprep.subr.bf16.mxu0 %v1868_v18  ;;  %v1878_v18 = vld [vmem:[#allocation7 + $0x8] sm:$0xff]  }
  0x82   : > { %1724 = vmatpush3.bf16.msra.mxu1 %v1867_v16  ;;  %v336_v16 = vshrl.u32 %v297_v12, 16 }
  0x83   : > { %1725 = vmatprep.subr.bf16.mxu1 %v1870_v20 }
  0x84   : > { %1566 = vmatpush3.bf16.msra.mxu0 %v1869_v19  ;;  %v368_v19 = vsel %vm2327_vm4, 0, %v313_v6  ;;  %v338_v0 = vrot.slane %v336_v16, 7 }
  0x85   : > { %1567 = vmatprep.subr.bf16.mxu0 %v1871_v21  ;;  %v346_v21 = vshll.u32 %v2371_v13, 16 }
  0x86   : > { %1726 = vmatpush3.bf16.msra.mxu1 %v1870_v20  ;;  %v405_v20 = vsel %vm2334_vm5, %v382_v8, 0  ;;  %v1882_v8 = vld [vmem:[#allocation7 + $0x88] sm:$0xff]  }
  0x87   : > { %1727 = vmatprep.subr.bf16.mxu1 %v1873_v29  ;;  %v387_v38 = vrot.slane %v346_v21, 1 }
  0x88   : > { %1568 = vmatpush3.bf16.msra.mxu0 %v1872_v34  ;;  %v385_v34 = vrot.slane %v339_v17, 1 }
  0x89   : > { %1745 = vmatprep.subr.bf16.mxu0 %v1877_v4  ;;  %v388_v47 = vor.u32 %v387_v38, %v343_v36 }
  0x8a   : > { %1728 = vmatpush3.bf16.msra.mxu1 %v1873_v29  ;;  %v329_v29 = vshrl.u32 %v296_v11, 16  ;;  %v386_v44 = vor.u32 %v385_v34, %v336_v16  ;;  %v1890_v16 = vld [vmem:[#allocation7 + $0x70] sm:$0xff]  }
  0x8b   : > { %642 = vmatmul.mubr.bf16.vlgmr.msra.gmra.mrb[0].mxu0 %v367_v1  ;;  %1633 = vmatprep.subr.bf16.mxu1 %v1874_v62  ;;  %v408_v56 = vsel %vm2334_vm5, %v388_v47, 0  ;;  %v345_v1 = vrot.slane %v343_v36, 7 }
  0x8c   : > { %649 = vmatprep.mubr.bf16.mxu0 %v293_v30  ;;  %1746 = vmatpush3.bf16.msra.mxu0 %v1877_v4  ;;  %v383_v30 = vrot.slane %v332_v15, 1  ;;  %v407_v55 = vsel %vm2334_vm5, %v386_v44, 0  ;;  %v331_v60 = vrot.slane %v329_v29, 7  ;;  %v352_v4 = vrot.slane %v350_v57, 7 }
  0x8d   : > { %1730 = vmatmul.mubr.bf16.vlgmr.msra.gmra.mrb[0].mxu1 %v403_v5  ;;  %v348_v2 = vor.u32 %v346_v21, %v345_v1  ;;  %1747 = vmatprep.subr.bf16.mxu0 %v1882_v8  ;;  %v1894_v21 = vld [vmem:[#allocation7 + $0x38] sm:$0xff]  }
  0x8e   : > { %1733 = vmatprep.mubr.bf16.mxu1 %v404_v7  ;;  %1634 = vmatpush3.bf16.msra.mxu1 %v1875_v3  ;;  %v384_v43 = vor.u32 %v383_v30, %v329_v29  ;;  %v334_v62 = vor.u32 %v332_v15, %v331_v60  ;;  %v355_v5 = vor.u32 %v353_v39, %v352_v4  ;;  %v1881_v7 = vld [vmem:[#allocation7 + $0x58] sm:$0xff]   ;;  %v1888_v15 = vld [vmem:[#allocation7 + $0x28] sm:$0xff]  }
  0x8f   : > { %1635 = vmatprep.subr.bf16.mxu1 %v1876_v9  ;;  %v373_v3 = vsel %vm2327_vm4, 0, %v348_v2  ;;  %v1883_v9 = vld [vmem:[#allocation7 + $0x18] sm:$0xff]  }
  0x90   : > { %v406_v49 = vsel %vm2334_vm5, %v384_v43, 0  ;;  %v371_v63 = vsel %vm2327_vm4, 0, %v334_v62  ;;  %v374_v6 = vsel %vm2327_vm4, 0, %v355_v5  ;;  %1748 = vmatpush3.bf16.msra.mxu0 %v1882_v8  ;;  %v1897_v29 = vld [vmem:[#allocation7 + $0xb8] sm:$0xff]  }
  0x92   : > { %1636 = vmatpush3.bf16.msra.mxu1 %v1878_v18  ;;  %v1891_v18 = vld [vmem:[#allocation7 + $0x30] sm:$0xff]  }
  0x93   : > { %650 = vmatmul.mubr.bf16.gmra.mrb[4].mxu0 %v368_v19  ;;  %1637 = vmatprep.subr.bf16.mxu1 %v1879_v35  ;;  %v1893_v19 = vld [vmem:[#allocation7 + $0x78] sm:$0xff]   ;;  %v2414_v35 = vld [vmem:[%s2598_s2] ss:$0 sm:$0xff] }
  0x94   : > { %657 = vmatprep.mubr.bf16.mxu0 %v2312_v31  ;;  %v389_v31 = vrot.slane %v353_v39, 1 }
  0x95   : > { %1734 = vmatmul.mubr.bf16.gmra.mrb[4].mxu1 %v405_v20  ;;  %v1895_v20 = vld [vmem:[#allocation7 + $0xa8] sm:$0xff]  }
  0x96   : > { %1737 = vmatprep.mubr.bf16.mxu1 %v406_v49  ;;  %1638 = vmatpush3.bf16.msra.mxu1 %v1880_v41  ;;  %v390_v58 = vor.u32 %v389_v31, %v350_v57 }
  0x97   : > { %1639 = vmatprep.subr.bf16.mxu1 %v1881_v7 }
  0x98   : > { %v409_v61 = vsel %vm2334_vm5, %v390_v58, 0 }
  0x9a   : > { %1640 = vmatpush3.bf16.msra.mxu1 %v1883_v9 }
  0x9b   : > { %658 = vmatmul.mubr.bf16.gmra.mrb[8].mxu0 %v369_v40  ;;  %1641 = vmatprep.subr.bf16.mxu1 %v1884_v10 }
  0x9c   : > { %665 = vmatprep.mubr.bf16.mxu0 %v2322_v37  ;;  %v341_v37 = vor.u32 %v339_v17, %v338_v0  ;;  %v1892_v17 = vld [vmem:[#allocation7 + $0xa0] sm:$0xff]  }
  0x9d   : > { %1738 = vmatmul.mubr.bf16.gmra.mrb[8].mxu1 %v407_v55 }
  0x9e   : > { %1741 = vmatprep.mubr.bf16.mxu1 %v408_v56  ;;  %v372_v45 = vsel %vm2327_vm4, 0, %v341_v37 }
  0xa3   : > { %666 = vmatmul.mubr.bf16.gmra.mrb[12].mxu0 %v370_v59 }
  0xa4   : > { %673 = vmatprep.mubr.bf16.mxu0 %v296_v11  ;;  %v1886_v11 = vld [vmem:[#allocation7 + $0x90] sm:$0xff]  }
  0xa5   : > { %1742 = vmatmul.mubr.bf16.gmra.mrb[12].mxu1 %v409_v61  ;;  %1749 = vmatprep.subr.bf16.mxu0 %v1886_v11 }
  0xa6   : > { %1750 = vmatpush3.bf16.msra.mxu0 %v1886_v11 }
  0xab   : > { %674 = vmatmul.mubr.bf16.gmra.mrb[16].mxu0 %v371_v63 }
  0xac   : > { %681 = vmatprep.mubr.bf16.mxu0 %v297_v12  ;;  %v1885_v12 = vld [vmem:[#allocation7 + $0x20] sm:$0xff]  }
  0xad   : > { %1642 = vmatpush3.bf16.msra.mxu1 %v1885_v12 }
  0xb3   : > { %682 = vmatmul.mubr.bf16.gmra.mrb[20].mxu0 %v372_v45 }
  0xb4   : > { %689 = vmatprep.mubr.bf16.mxu0 %v2371_v13  ;;  %v1887_v13 = vld [vmem:[#allocation7 + $0x68] sm:$0xff]  }
  0xb5   : > { %1643 = vmatprep.subr.bf16.mxu1 %v1887_v13 }
  0xb6   : > { %1644 = vmatpush3.bf16.msra.mxu1 %v1888_v15 }
  0xb7   : > { %1645 = vmatprep.subr.bf16.mxu1 %v1890_v16 }
  0xba   : > { %1646 = vmatpush3.bf16.msra.mxu1 %v1891_v18 }
  0xbb   : > { %690 = vmatmul.mubr.bf16.gmra.mrb[24].mxu0 %v373_v3  ;;  %1647 = vmatprep.subr.bf16.mxu1 %v1893_v19 }
  0xbc   : > { %697 = vmatprep.mubr.bf16.mxu0 %v2373_v14  ;;  %v1889_v14 = vld [vmem:[#allocation7 + $0x98] sm:$0xff]  }
  0xbd   : > { %1751 = vmatprep.subr.bf16.mxu0 %v1889_v14 }
  0xbe   : > { %1752 = vmatpush3.bf16.msra.mxu0 %v1889_v14  ;;  %1648 = vmatpush3.bf16.msra.mxu1 %v1894_v21 }
  0xbf   : > { %1753 = vmatprep.subr.bf16.mxu0 %v1892_v17 }
  0xc2   : > { %1754 = vmatpush3.bf16.msra.mxu0 %v1892_v17 }
  0xc3   : > { %698 = vmatmul.mubr.bf16.gmra.mrb[28].mxu0 %v374_v6  ;;  %1755 = vmatprep.subr.bf16.mxu0 %v1895_v20 }
  0xc6   : > { %1756 = vmatpush3.bf16.msra.mxu0 %v1895_v20 }
  0xc7   : > { %1757 = vmatprep.subr.bf16.mxu0 %v1896_v25 }
  0xca   : > { %1758 = vmatpush3.bf16.msra.mxu0 %v1896_v25 }
  0xcb   : > { %1759 = vmatprep.subr.bf16.mxu0 %v1897_v29 }
  0xce   : > { %1760 = vmatpush3.bf16.msra.mxu0 %v1897_v29 }
 0x15e   : > { %v1569_v30 = vpop.f32.mrb[0].mxu0 }
 0x15f   : > { %v1570_v34 = vpop.f32.mrb[1].mxu0 }
 0x160   : > { %v1571_v36 = vadd.f32 %v1570_v34, %v1569_v30  ;;  %v1731_v38 = vpop.f32.mrb[0].mxu1  ;;  %v1572_v39 = vpop.f32.mrb[2].mxu0 }
 0x161   : > { %v740_v41 = vpop.f32.mrb[1].mxu1  ;;  %v1573_v43 = vpop.f32.mrb[3].mxu0 }
 0x162   : > { %v644_v44 = vadd.f32 %v1571_v36, %v2414_v35  ;;  %v1574_v47 = vadd.f32 %v1573_v43, %v1572_v39  ;;  %v1732_v40 = vpop.f32.mrb[2].mxu1 }
 0x163   : > { %v743_v48 = vpop.f32.mrb[3].mxu1 }
 0x164   : > { %v741_v49 = vadd.f32 %v740_v41, %v644_v44  ;;  %v647_v55 = vadd.f32 %v1574_v47, %v2414_v35 }
 0x166   : > { %v744_v56 = vadd.f32 %v743_v48, %v647_v55  ;;  %v1575_v57 = vpop.f32.mrb[4].mxu0  ;;  %v803_v50 = vmax.f32 %v741_v49, 0.0 }
 0x167   : > { %v1576_v31 = vpop.f32.mrb[5].mxu0 }
 0x168   : > { %v804_v58 = vmax.f32 %v744_v56, 0.0  ;;  %v1577_v59 = vadd.f32 %v1576_v31, %v1575_v57  ;;  %v1578_v60 = vpop.f32.mrb[6].mxu0  ;;  %v2418_v61 = vpop.f32.mrb[4].mxu1 }
 0x169   : > { %v1579_v62 = vpop.f32.mrb[7].mxu0  ;;  %v756_v63 = vpop.f32.mrb[5].mxu1 }
 0x16a   : > { %v819_v0 = vpack.c.bf16 %v804_v58, %v803_v50  ;;  %v652_v37 = vadd.f32 %v1577_v59, %v2414_v35  ;;  %v1580_v45 = vadd.f32 %v1579_v62, %v1578_v60  ;;  %v2421_v1 = vpop.f32.mrb[6].mxu1 }
 0x16b   : > { %v759_v2 = vpop.f32.mrb[7].mxu1 }
 0x16c   : > { %v828_v3 = vshrl.u32 %v819_v0, 16  ;;  %v831_v4 = vshll.u32 %v819_v0, 16  ;;  %v749_v5 = vadd.f32 %v1731_v38, %v652_v37  ;;  %v655_v6 = vadd.f32 %v1580_v45, %v2414_v35  ;;  %1162 = vmatprep.mubr.bf16.mxu1 %v819_v0 }
 0x16e   : > { %v830_v7 = vrot.slane %v828_v3, 7  ;;  %v752_v8 = vadd.f32 %v1732_v40, %v655_v6  ;;  %v1581_v9 = vpop.f32.mrb[8].mxu0  ;;  %v899_v10 = vrot.slane %v831_v4, 1  ;;  %v805_v18 = vmax.f32 %v749_v5, 0.0 }
 0x16f   : > { %v1582_v11 = vpop.f32.mrb[9].mxu0 }
 0x170   : > { %v806_v12 = vmax.f32 %v752_v8, 0.0  ;;  %v1583_v13 = vadd.f32 %v1582_v11, %v1581_v9  ;;  %v1584_v14 = vpop.f32.mrb[10].mxu0  ;;  %v833_v15 = vor.u32 %v831_v4, %v830_v7  ;;  %v900_v16 = vor.u32 %v899_v10, %v828_v3  ;;  %v2424_v17 = vpop.f32.mrb[8].mxu1 }
 0x171   : > { %v1585_v19 = vpop.f32.mrb[11].mxu0  ;;  %v772_v20 = vpop.f32.mrb[9].mxu1 }
 0x172   : > { %v660_v21 = vadd.f32 %v1583_v13, %v2414_v35  ;;  %v1586_v25 = vadd.f32 %v1585_v19, %v1584_v14  ;;  %v891_v29 = vsel %vm2327_vm4, 0, %v833_v15  ;;  %v923_v30 = vsel %vm2334_vm5, %v900_v16, 0  ;;  %v2431_v34 = vpop.f32.mrb[10].mxu1 }
 0x173   : > { %1163 = vmatmul.mubr.bf16.vlgmr.msra.gmra.mrb[16].mxu1 %v891_v29  ;;  %1761 = vmatprep.mubr.bf16.mxu0 %v923_v30  ;;  %v820_v36 = vpack.c.bf16 %v806_v12, %v805_v18  ;;  %v775_v38 = vpop.f32.mrb[11].mxu1 }
 0x174   : > { %v757_v39 = vadd.f32 %v756_v63, %v660_v21  ;;  %v663_v41 = vadd.f32 %v1586_v25, %v2414_v35 }
 0x175   : > { %1170 = vmatprep.mubr.bf16.mxu1 %v820_v36  ;;  %v835_v43 = vshrl.u32 %v820_v36, 16  ;;  %v838_v44 = vshll.u32 %v820_v36, 16 }
 0x176   : > { %v760_v47 = vadd.f32 %v759_v2, %v663_v41  ;;  %v1587_v40 = vpop.f32.mrb[12].mxu0  ;;  %v807_v56 = vmax.f32 %v757_v39, 0.0 }
 0x177   : > { %v1588_v48 = vpop.f32.mrb[13].mxu0  ;;  %v837_v49 = vrot.slane %v835_v43, 7  ;;  %v901_v55 = vrot.slane %v838_v44, 1 }
 0x178   : > { %v808_v57 = vmax.f32 %v760_v47, 0.0  ;;  %v1589_v31 = vadd.f32 %v1588_v48, %v1587_v40  ;;  %v1590_v50 = vpop.f32.mrb[14].mxu0  ;;  %v2434_v58 = vpop.f32.mrb[12].mxu1 }
 0x179   : > { %v1591_v59 = vpop.f32.mrb[15].mxu0  ;;  %v840_v60 = vor.u32 %v838_v44, %v837_v49  ;;  %v902_v62 = vor.u32 %v901_v55, %v835_v43  ;;  %v2436_v63 = vpop.f32.mrb[13].mxu1 }
 0x17a   : > { %v821_v0 = vpack.c.bf16 %v808_v57, %v807_v56  ;;  %v668_v37 = vadd.f32 %v1589_v31, %v2414_v35  ;;  %v1592_v45 = vadd.f32 %v1591_v59, %v1590_v50  ;;  %v2439_v2 = vpop.f32.mrb[14].mxu1 }
 0x17b   : > { %v892_v3 = vsel %vm2327_vm4, 0, %v840_v60  ;;  %v924_v4 = vsel %vm2334_vm5, %v902_v62, 0  ;;  %v2445_v5 = vpop.f32.mrb[15].mxu1 }
 0x17c   : > { %v842_v6 = vshrl.u32 %v821_v0, 16  ;;  %v765_v7 = vadd.f32 %v2418_v61, %v668_v37  ;;  %v671_v8 = vadd.f32 %v1592_v45, %v2414_v35  ;;  %1171 = vmatmul.mubr.bf16.gmra.mrb[20].mxu1 %v892_v3  ;;  %1762 = vmatmul.mubr.bf16.vlgmr.msra.gmra.mrb[32].mxu0 %v924_v4  ;;  %v845_v9 = vshll.u32 %v821_v0, 16 }
 0x17d   : > { %1178 = vmatprep.mubr.bf16.mxu1 %v821_v0 }
 0x17e   : > { %v768_v10 = vadd.f32 %v2421_v1, %v671_v8  ;;  %v1593_v11 = vpop.f32.mrb[16].mxu0  ;;  %v844_v12 = vrot.slane %v842_v6, 7  ;;  %v903_v13 = vrot.slane %v845_v9, 1  ;;  %v809_v25 = vmax.f32 %v765_v7, 0.0 }
 0x17f   : > { %v1594_v14 = vpop.f32.mrb[17].mxu0 }
 0x180   : > { %v810_v15 = vmax.f32 %v768_v10, 0.0  ;;  %v1595_v16 = vadd.f32 %v1594_v14, %v1593_v11  ;;  %v1596_v18 = vpop.f32.mrb[18].mxu0  ;;  %v847_v19 = vor.u32 %v845_v9, %v844_v12  ;;  %v904_v21 = vor.u32 %v903_v13, %v842_v6 }
 0x181   : > { %v1597_v29 = vpop.f32.mrb[19].mxu0 }
 0x182   : > { %v676_v61 = vadd.f32 %v1595_v16, %v2414_v35  ;;  %v1598_v30 = vadd.f32 %v1597_v29, %v1596_v18  ;;  %v893_v36 = vsel %vm2327_vm4, 0, %v847_v19  ;;  %v925_v1 = vsel %vm2334_vm5, %v904_v21, 0 }
 0x183   : > { %1765 = vmatprep.mubr.bf16.mxu0 %v925_v1  ;;  %v822_v39 = vpack.c.bf16 %v810_v15, %v809_v25 }
 0x184   : > { %v773_v41 = vadd.f32 %v772_v20, %v676_v61  ;;  %v679_v43 = vadd.f32 %v1598_v30, %v2414_v35  ;;  %1179 = vmatmul.mubr.bf16.gmra.mrb[24].mxu1 %v893_v36 }
 0x185   : > { %1186 = vmatprep.mubr.bf16.mxu1 %v822_v39  ;;  %v849_v44 = vshrl.u32 %v822_v39, 16  ;;  %v852_v47 = vshll.u32 %v822_v39, 16 }
 0x186   : > { %v776_v40 = vadd.f32 %v775_v38, %v679_v43  ;;  %v1599_v48 = vpop.f32.mrb[20].mxu0  ;;  %v811_v57 = vmax.f32 %v773_v41, 0.0 }
 0x187   : > { %v1600_v49 = vpop.f32.mrb[21].mxu0  ;;  %v851_v55 = vrot.slane %v849_v44, 7  ;;  %v905_v56 = vrot.slane %v852_v47, 1 }
 0x188   : > { %v812_v31 = vmax.f32 %v776_v40, 0.0  ;;  %v1601_v50 = vadd.f32 %v1600_v49, %v1599_v48  ;;  %v1602_v59 = vpop.f32.mrb[22].mxu0 }
 0x189   : > { %v1603_v60 = vpop.f32.mrb[23].mxu0  ;;  %v854_v62 = vor.u32 %v852_v47, %v851_v55  ;;  %v906_v0 = vor.u32 %v905_v56, %v849_v44 }
 0x18a   : > { %v823_v37 = vpack.c.bf16 %v812_v31, %v811_v57  ;;  %v684_v20 = vadd.f32 %v1601_v50, %v2414_v35  ;;  %v1604_v45 = vadd.f32 %v1603_v60, %v1602_v59 }
 0x18b   : > { %v894_v3 = vsel %vm2327_vm4, 0, %v854_v62  ;;  %v926_v38 = vsel %vm2334_vm5, %v906_v0, 0 }
 0x18c   : > { %v856_v4 = vshrl.u32 %v823_v37, 16  ;;  %v781_v6 = vadd.f32 %v2424_v17, %v684_v20  ;;  %v687_v7 = vadd.f32 %v1604_v45, %v2414_v35  ;;  %1187 = vmatmul.mubr.bf16.gmra.mrb[28].mxu1 %v894_v3  ;;  %1766 = vmatmul.mubr.bf16.gmra.mrb[36].mxu0 %v926_v38  ;;  %v859_v8 = vshll.u32 %v823_v37, 16 }
 0x18d   : > { %1194 = vmatprep.mubr.bf16.mxu1 %v823_v37 }
 0x18e   : > { %v784_v9 = vadd.f32 %v2431_v34, %v687_v7  ;;  %v1605_v10 = vpop.f32.mrb[24].mxu0  ;;  %v858_v11 = vrot.slane %v856_v4, 7  ;;  %v907_v12 = vrot.slane %v859_v8, 1  ;;  %v813_v21 = vmax.f32 %v781_v6, 0.0 }
 0x18f   : > { %v1606_v13 = vpop.f32.mrb[25].mxu0 }
 0x190   : > { %v814_v14 = vmax.f32 %v784_v9, 0.0  ;;  %v1607_v15 = vadd.f32 %v1606_v13, %v1605_v10  ;;  %v1608_v16 = vpop.f32.mrb[26].mxu0  ;;  %v861_v18 = vor.u32 %v859_v8, %v858_v11  ;;  %v908_v19 = vor.u32 %v907_v12, %v856_v4 }
 0x191   : > { %v1609_v25 = vpop.f32.mrb[27].mxu0 }
 0x192   : > { %v692_v17 = vadd.f32 %v1607_v15, %v2414_v35  ;;  %v1610_v29 = vadd.f32 %v1609_v25, %v1608_v16  ;;  %v895_v61 = vsel %vm2327_vm4, 0, %v861_v18  ;;  %v927_v34 = vsel %vm2334_vm5, %v908_v19, 0 }
 0x193   : > { %1769 = vmatprep.mubr.bf16.mxu0 %v927_v34  ;;  %v824_v30 = vpack.c.bf16 %v814_v14, %v813_v21 }
 0x194   : > { %v789_v36 = vadd.f32 %v2436_v63, %v692_v17  ;;  %v695_v1 = vadd.f32 %v1610_v29, %v2414_v35  ;;  %1195 = vmatmul.mubr.bf16.gmra.mrb[32].mxu1 %v895_v61 }
 0x195   : > { %1202 = vmatprep.mubr.bf16.mxu1 %v824_v30  ;;  %v863_v39 = vshrl.u32 %v824_v30, 16  ;;  %v866_v41 = vshll.u32 %v824_v30, 16  ;;  %v2491_v30 = vld [vmem:[%s2600_s4] ss:$0 sm:$0xff] }
 0x196   : > { %v792_v43 = vadd.f32 %v2445_v5, %v695_v1  ;;  %v1611_v44 = vpop.f32.mrb[28].mxu0  ;;  %v815_v49 = vmax.f32 %v789_v36, 0.0 }
 0x197   : > { %v1612_v47 = vpop.f32.mrb[29].mxu0  ;;  %v865_v40 = vrot.slane %v863_v39, 7  ;;  %v909_v48 = vrot.slane %v866_v41, 1 }
 0x198   : > { %v816_v55 = vmax.f32 %v792_v43, 0.0  ;;  %v1613_v56 = vadd.f32 %v1612_v47, %v1611_v44  ;;  %v1614_v57 = vpop.f32.mrb[30].mxu0 }
 0x199   : > { %v1615_v31 = vpop.f32.mrb[31].mxu0  ;;  %v868_v50 = vor.u32 %v866_v41, %v865_v40  ;;  %v910_v59 = vor.u32 %v909_v48, %v863_v39 }
 0x19a   : > { %v825_v63 = vpack.c.bf16 %v816_v55, %v815_v49  ;;  %v700_v60 = vadd.f32 %v1613_v56, %v2414_v35  ;;  %v1616_v62 = vadd.f32 %v1615_v31, %v1614_v57 }
 0x19b   : > { %v896_v0 = vsel %vm2327_vm4, 0, %v868_v50  ;;  %v928_v5 = vsel %vm2334_vm5, %v910_v59, 0 }
 0x19c   : > { %v870_v37 = vshrl.u32 %v825_v63, 16  ;;  %v797_v20 = vadd.f32 %v2434_v58, %v700_v60  ;;  %v703_v45 = vadd.f32 %v1616_v62, %v2414_v35  ;;  %1203 = vmatmul.mubr.bf16.gmra.mrb[36].mxu1 %v896_v0  ;;  %1770 = vmatmul.mubr.bf16.gmra.mrb[40].mxu0 %v928_v5  ;;  %v873_v3 = vshll.u32 %v825_v63, 16 }
 0x19d   : > { %1210 = vmatprep.mubr.bf16.mxu1 %v825_v63 }
 0x19e   : > { %v800_v38 = vadd.f32 %v2439_v2, %v703_v45  ;;  %v872_v4 = vrot.slane %v870_v37, 7  ;;  %v911_v6 = vrot.slane %v873_v3, 1  ;;  %v817_v7 = vmax.f32 %v797_v20, 0.0 }
 0x1a0   : > { %v818_v8 = vmax.f32 %v800_v38, 0.0  ;;  %v875_v9 = vor.u32 %v873_v3, %v872_v4  ;;  %v912_v10 = vor.u32 %v911_v6, %v870_v37 }
 0x1a2   : > { %v897_v11 = vsel %vm2327_vm4, 0, %v875_v9  ;;  %v929_v58 = vsel %vm2334_vm5, %v912_v10, 0  ;;  %v826_v12 = vpack.c.bf16 %v818_v8, %v817_v7 }
 0x1a3   : > { %1773 = vmatprep.mubr.bf16.mxu0 %v929_v58 }
 0x1a4   : > { %1211 = vmatmul.mubr.bf16.gmra.mrb[40].mxu1 %v897_v11  ;;  %v877_v35 = vshrl.u32 %v826_v12, 16  ;;  %v880_v13 = vshll.u32 %v826_v12, 16 }
 0x1a5   : > { %1218 = vmatprep.mubr.bf16.mxu1 %v826_v12 }
 0x1a6   : > { %v879_v14 = vrot.slane %v877_v35, 7  ;;  %v913_v2 = vrot.slane %v880_v13, 1 }
 0x1a8   : > { %v882_v15 = vor.u32 %v880_v13, %v879_v14  ;;  %v914_v16 = vor.u32 %v913_v2, %v877_v35 }
 0x1aa   : > { %v898_v18 = vsel %vm2327_vm4, 0, %v882_v15  ;;  %v930_v19 = vsel %vm2334_vm5, %v914_v16, 0 }
 0x1ab   : > { %1774 = vmatmul.mubr.bf16.gmra.mrb[44].mxu0 %v930_v19 }
 0x1ac   : > { %1219 = vmatmul.mubr.bf16.gmra.mrb[44].mxu1 %v898_v18 }
 0x246   : > { %v1649_v21 = vpop.f32.mrb[16].mxu1 }
 0x247   : > { %v1650_v25 = vpop.f32.mrb[17].mxu1 }
 0x248   : > { %v1651_v17 = vadd.f32 %v1650_v25, %v1649_v21  ;;  %v1652_v29 = vpop.f32.mrb[18].mxu1 }
 0x249   : > { %v1653_v61 = vpop.f32.mrb[19].mxu1 }
 0x24a   : > { %v1654_v34 = vadd.f32 %v1653_v61, %v1652_v29  ;;  %v1165_v42 = vadd.f32 %v1651_v17, %v2491_v30 }
 0x24c   : > { %v1168_v40 = vadd.f32 %v1654_v34, %v2491_v30 }
 0x24f   : > { %v1655_v36 = vpop.f32.mrb[20].mxu1  ;;  %v1763_v1 = vpop.f32.mrb[32].mxu0 }
 0x250   : > { %v1656_v39 = vpop.f32.mrb[21].mxu1  ;;  %v1261_v46 = vpop.f32.mrb[33].mxu0 }
 0x251   : > { %v1657_v41 = vadd.f32 %v1656_v39, %v1655_v36  ;;  %v1262_v43 = vadd.f32 %v1261_v46, %v1165_v42  ;;  %v1658_v44 = vpop.f32.mrb[22].mxu1  ;;  %v1764_v47 = vpop.f32.mrb[34].mxu0 }
 0x252   : > { %v1659_v48 = vpop.f32.mrb[23].mxu1  ;;  %v1264_v49 = vpop.f32.mrb[35].mxu0 }
 0x253   : > { %v1173_v55 = vadd.f32 %v1657_v41, %v2491_v30  ;;  %v1324_v56 = vadd.f32 %v1262_v43, %v2289_v22  ;;  %v1660_v57 = vadd.f32 %v1659_v48, %v1658_v44  ;;  %v1265_v31 = vadd.f32 %v1264_v49, %v1168_v40 }
 0x255   : > { %v1270_v50 = vadd.f32 %v1763_v1, %v1173_v55  ;;  %v1340_v59 = vmax.f32 %v1324_v56, 0.0  ;;  %v1176_v63 = vadd.f32 %v1660_v57, %v2491_v30  ;;  %v1325_v60 = vadd.f32 %v1265_v31, %v2292_v23 }
 0x257   : > { %v1326_v62 = vadd.f32 %v1270_v50, %v2295_v24  ;;  %1356 = vst [vmem:[%s2502_s11] sm:$0xff] %v1340_v59  ;;  %v1273_v0 = vadd.f32 %v1764_v47, %v1176_v63  ;;  %v1341_v22 = vmax.f32 %v1325_v60, 0.0  ;;  %v1661_v5 = vpop.f32.mrb[24].mxu1 }
 0x258   : > { %v1662_v37 = vpop.f32.mrb[25].mxu1 }
 0x259   : > { %v1342_v20 = vmax.f32 %v1326_v62, 0.0  ;;  %v1327_v45 = vadd.f32 %v1273_v0, %v2300_v26  ;;  %1357 = vst [vmem:[%s2502_s11 + $0x8] sm:$0xff] %v1341_v22  ;;  %v1663_v3 = vadd.f32 %v1662_v37, %v1661_v5  ;;  %v1664_v23 = vpop.f32.mrb[26].mxu1 }
 0x25a   : > { %v1665_v38 = vpop.f32.mrb[27].mxu1 }
 0x25b   : > { %1358 = vst [vmem:[%s2502_s11 + $0x10] sm:$0xff] %v1342_v20  ;;  %v1343_v24 = vmax.f32 %v1327_v45, 0.0  ;;  %v1666_v4 = vadd.f32 %v1665_v38, %v1664_v23  ;;  %v1181_v8 = vadd.f32 %v1663_v3, %v2491_v30 }
 0x25d   : > { %1359 = vst [vmem:[%s2502_s11 + $0x18] sm:$0xff] %v1343_v24  ;;  %v1184_v26 = vadd.f32 %v1666_v4, %v2491_v30 }
 0x25f   : > { %v1667_v6 = vpop.f32.mrb[28].mxu1  ;;  %v1767_v7 = vpop.f32.mrb[36].mxu0 }
 0x260   : > { %v1668_v9 = vpop.f32.mrb[29].mxu1  ;;  %v1277_v10 = vpop.f32.mrb[37].mxu0 }
 0x261   : > { %v1669_v11 = vadd.f32 %v1668_v9, %v1667_v6  ;;  %v1278_v58 = vadd.f32 %v1277_v10, %v1181_v8  ;;  %v1670_v12 = vpop.f32.mrb[30].mxu1  ;;  %v1768_v35 = vpop.f32.mrb[38].mxu0 }
 0x262   : > { %v1671_v13 = vpop.f32.mrb[31].mxu1  ;;  %v1280_v14 = vpop.f32.mrb[39].mxu0 }
 0x263   : > { %v1189_v2 = vadd.f32 %v1669_v11, %v2491_v30  ;;  %v1328_v15 = vadd.f32 %v1278_v58, %v2303_v27  ;;  %v1672_v16 = vadd.f32 %v1671_v13, %v1670_v12  ;;  %v1281_v18 = vadd.f32 %v1280_v14, %v1184_v26 }
 0x265   : > { %v1286_v19 = vadd.f32 %v1767_v7, %v1189_v2  ;;  %v1344_v21 = vmax.f32 %v1328_v15, 0.0  ;;  %v1192_v25 = vadd.f32 %v1672_v16, %v2491_v30  ;;  %v1329_v17 = vadd.f32 %v1281_v18, %v2306_v28  ;;  %v1898_v2 = vld [vmem:[%s2278_s6 + $0x60] sm:$0xff] }
 0x267   : > { %v1330_v29 = vadd.f32 %v1286_v19, %v2315_v32  ;;  %1360 = vst [vmem:[%s2502_s11 + $0x20] sm:$0xff] %v1344_v21  ;;  %v1289_v61 = vadd.f32 %v1768_v35, %v1192_v25  ;;  %v1345_v34 = vmax.f32 %v1329_v17, 0.0  ;;  %v1673_v36 = vpop.f32.mrb[32].mxu1  ;;  %v1899_v17 = vld [vmem:[%s2278_s6 + $0x68] sm:$0xff] }
 0x268   : > { %v1674_v1 = vpop.f32.mrb[33].mxu1 }
 0x269   : > { %v1346_v42 = vmax.f32 %v1330_v29, 0.0  ;;  %v1331_v27 = vadd.f32 %v1289_v61, %v2318_v33  ;;  %1361 = vst [vmem:[%s2502_s11 + $0x28] sm:$0xff] %v1345_v34  ;;  %v1675_v39 = vadd.f32 %v1674_v1, %v1673_v36  ;;  %v1676_v46 = vpop.f32.mrb[34].mxu1  ;;  %v1900_v1 = vld [vmem:[%s2278_s6 + $0x70] sm:$0xff] }
 0x26a   : > { %v1677_v41 = vpop.f32.mrb[35].mxu1 }
 0x26b   : > { %1362 = vst [vmem:[%s2502_s11 + $0x30] sm:$0xff] %v1346_v42  ;;  %v1347_v43 = vmax.f32 %v1331_v27, 0.0  ;;  %v1678_v44 = vadd.f32 %v1677_v41, %v1676_v46  ;;  %v1197_v32 = vadd.f32 %v1675_v39, %v2491_v30  ;;  %v1901_v46 = vld [vmem:[%s2278_s6 + $0x78] sm:$0xff] }
 0x26d   : > { %1363 = vst [vmem:[%s2502_s11 + $0x38] sm:$0xff] %v1347_v43  ;;  %v1200_v33 = vadd.f32 %v1678_v44, %v2491_v30 }
 0x26f   : > { %v1679_v28 = vpop.f32.mrb[36].mxu1  ;;  %v1771_v47 = vpop.f32.mrb[40].mxu0 }
 0x270   : > { %v1680_v40 = vpop.f32.mrb[37].mxu1  ;;  %v1293_v48 = vpop.f32.mrb[41].mxu0 }
 0x271   : > { %v1681_v49 = vadd.f32 %v1680_v40, %v1679_v28  ;;  %v1294_v55 = vadd.f32 %v1293_v48, %v1197_v32  ;;  %v1682_v56 = vpop.f32.mrb[38].mxu1  ;;  %v1772_v57 = vpop.f32.mrb[42].mxu0 }
 0x272   : > { %v1683_v31 = vpop.f32.mrb[39].mxu1  ;;  %v1296_v50 = vpop.f32.mrb[43].mxu0 }
 0x273   : > { %v1205_v59 = vadd.f32 %v1681_v49, %v2491_v30  ;;  %v1332_v63 = vadd.f32 %v1294_v55, %v2340_v51  ;;  %v1684_v60 = vadd.f32 %v1683_v31, %v1682_v56  ;;  %v1297_v62 = vadd.f32 %v1296_v50, %v1200_v33 }
 0x275   : > { %v1302_v0 = vadd.f32 %v1771_v47, %v1205_v59  ;;  %v1348_v22 = vmax.f32 %v1332_v63, 0.0  ;;  %v1208_v5 = vadd.f32 %v1684_v60, %v2491_v30  ;;  %v1333_v37 = vadd.f32 %v1297_v62, %v2343_v52 }
 0x277   : > { %v1334_v20 = vadd.f32 %v1302_v0, %v2346_v53  ;;  %1364 = vst [vmem:[%s2502_s11 + $0x40] sm:$0xff] %v1348_v22  ;;  %v1305_v45 = vadd.f32 %v1772_v57, %v1208_v5  ;;  %v1349_v3 = vmax.f32 %v1333_v37, 0.0  ;;  %v1685_v23 = vpop.f32.mrb[40].mxu1 }
 0x278   : > { %v1686_v38 = vpop.f32.mrb[41].mxu1 }
 0x279   : > { %v1350_v24 = vmax.f32 %v1334_v20, 0.0  ;;  %v1335_v51 = vadd.f32 %v1305_v45, %v2349_v54  ;;  %1365 = vst [vmem:[%s2502_s11 + $0x48] sm:$0xff] %v1349_v3  ;;  %v1687_v4 = vadd.f32 %v1686_v38, %v1685_v23  ;;  %v1688_v6 = vpop.f32.mrb[42].mxu1 }
 0x27a   : > { %v1689_v7 = vpop.f32.mrb[43].mxu1 }
 0x27b   : > { %1366 = vst [vmem:[%s2502_s11 + $0x50] sm:$0xff] %v1350_v24  ;;  %v1351_v8 = vmax.f32 %v1335_v51, 0.0  ;;  %v1690_v9 = vadd.f32 %v1689_v7, %v1688_v6  ;;  %v1213_v53 = vadd.f32 %v1687_v4, %v2491_v30 }
 0x27d   : > { %1367 = vst [vmem:[%s2502_s11 + $0x58] sm:$0xff] %v1351_v8  ;;  %v1216_v54 = vadd.f32 %v1690_v9, %v2491_v30 }
 0x27e   : > { %v1775_v52 = vpop.f32.mrb[44].mxu0 }
 0x27f   : > { %v1691_v10 = vpop.f32.mrb[44].mxu1  ;;  %v1309_v11 = vpop.f32.mrb[45].mxu0 }
 0x280   : > { %v1692_v58 = vpop.f32.mrb[45].mxu1  ;;  %v1310_v12 = vadd.f32 %v1309_v11, %v1213_v53  ;;  %v1776_v35 = vpop.f32.mrb[46].mxu0 }
 0x281   : > { %v1693_v26 = vadd.f32 %v1692_v58, %v1691_v10  ;;  %v1694_v13 = vpop.f32.mrb[46].mxu1  ;;  %v1312_v14 = vpop.f32.mrb[47].mxu0 }
 0x282   : > { %v1336_v15 = vadd.f32 %v1898_v2, %v1310_v12  ;;  %v1695_v16 = vpop.f32.mrb[47].mxu1  ;;  %v1313_v18 = vadd.f32 %v1312_v14, %v1216_v54 }
 0x283   : > { %v1221_v19 = vadd.f32 %v1693_v26, %v2491_v30  ;;  %v1696_v21 = vadd.f32 %v1695_v16, %v1694_v13 }
 0x284   : > { %v1352_v25 = vmax.f32 %v1336_v15, 0.0  ;;  %v1337_v29 = vadd.f32 %v1899_v17, %v1313_v18 }
 0x285   : > { %v1318_v61 = vadd.f32 %v1775_v52, %v1221_v19  ;;  %v1224_v34 = vadd.f32 %v1696_v21, %v2491_v30 }
 0x286   : > { %1368 = vst [vmem:[%s2502_s11 + $0x60] sm:$0xff] %v1352_v25  ;;  %v1353_v36 = vmax.f32 %v1337_v29, 0.0 }
 0x287   : > { %v1338_v42 = vadd.f32 %v1900_v1, %v1318_v61  ;;  %v1321_v27 = vadd.f32 %v1776_v35, %v1224_v34 }
 0x288   : > { %1369 = vst [vmem:[%s2502_s11 + $0x68] sm:$0xff] %v1353_v36 }
 0x289   : > { %v1354_v39 = vmax.f32 %v1338_v42, 0.0  ;;  %v1339_v41 = vadd.f32 %v1901_v46, %v1321_v27 }
 0x28b   : > { %1370 = vst [vmem:[%s2502_s11 + $0x70] sm:$0xff] %v1354_v39  ;;  %v1355_v30 = vmax.f32 %v1339_v41, 0.0 }
 0x28d   : > { %1371 = vst [vmem:[%s2502_s11 + $0x78] sm:$0xff] %v1355_v30 }
 0x28e   : > { %2001 = shalt.err (!%p1998_p2)
}
 0x28f   : > { %s2002_s6 = scalar_lea.hbm %s2548_s9, 2048  ;;  %s2006_s8 = scalar_lea.hbm %s2601_s5, 4096 }
 0x290   : > { %p2003_p13 = scmp.ne.s32.totalorder %s2548_s9, %s2002_s6  ;;  %p2007_p4 = scmp.lt.u32.totalorder %s2548_s9, %s2601_s5 }
 0x291   : > { %p2008_p5 = scmp.lt.u32.totalorder %s2006_s8, %s2002_s6  ;;  %p2010_p11 = scmp.lt.u32.totalorder %s2002_s6, %s2548_s9 }
 0x292   : > { %p2004_p6 = pnand %p2003_p13, %p2619_p0 }
 0x293   : > { %p2009_p8 = por %p2008_p5, %p2007_p4 }
 0x294   : > { %p2005_p10 = pneg %p2004_p6 }
 0x295   : > { %p2011_p1 = por %p2010_p11, %p2009_p8 }
 0x297   : > { %p2012_p3 = pnand %p2011_p1, %p2005_p10 }
 0x299   : > { %2015 = shalt.err (!%p2012_p3)
}
 0x29a   : > { %s2068_s28 = smov 128   ;;  %s2069_s15 = smov 8  }
 0x29b   : > { %1787 = dma.vmem_to_hbm [thread:$0]  (%p2619_p0), %s2550_s30, 2048, %s2548_s9, %s1373_s12, %s2068_s28, %s2068_s28, %s2069_s15  }
 0x29c PF: > { %s1402_s16 = sand.u32 1, %s2046_s18   ;;  %p2620_p7 = scmp.ne.s32.totalorder %s2606_s25, 0 }
 0x29d   : > { %p2621_p9 = scmp.ge.s32.totalorder %s2058_s21, 2  ;;  %s1403_s22 = scalar_lea.sflag [#allocation4], %s1402_s16 }
 0x29f   : > { %p1801_p12 = pnand %p2621_p9, %p2620_p7 }
 0x2a1   : > { %2041 = dma.done.wait (!%p1801_p12), %s1403_s22, 2048  }
 0x2a2   : > { %2043 = vsyncadd (!%p1801_p12), %s1403_s22, 4294965248  ;;  %p19_p2 = scmp.ge.s32.totalorder %s2210_s14, 4   ;;  %s2622_s18 = smov %s2050_s19 }
 0x2a3   : > { %s2623_s19 = smov %s2054_s20  ;;  %s2624_s20 = smov %s2226_s27 }
 0x2a4   : > { %s2625_s21 = smov %s2210_s14  ;;  %21 = sbr.rel (!%p19_p2) target bundleno = 6 (0x6), region = 93 }
 0x2ab   :  { %1408 = vsyncpa [#allocation3], 1 }
 0x2ac   :  { %1410 = vsyncpa [#allocation3 + $0x1], 1 }
 0x2ad   :  { %1411 = vsyncpa [#allocation6], 1 }
 0x2ae   :  { %1412 = vsyncpa [#allocation4], 1 }
 0x2af   :  { %1414 = vsyncpa [#allocation4 + $0x1], 1 }

</bundles_post_ra>
